<compile_context>
chip_gen: v7x
topology: tpu7x:2x2x1
jax: 0.10.0
libtpu: 0.0.40
codegen_flags: <defaults>
</compile_context>

<pallas_src>
import jax
import jax.numpy as jnp
from jax import lax
from jax.experimental import pallas as pl
from jax.experimental.pallas import tpu as pltpu


def _round_up(x, m):
    return ((x + m - 1) // m) * m


_SUB = 16       # bf16 sublane packing for the row (M) tiles
_TM_MAX = 1024  # big tiles amortize the ~0.35us per-grid-step overhead


def _choose_row_tile(M):
    """Pick (TM, Mp): TM multiple of 16, ideally dividing M (no pad pass) and
    giving >= 2 grid blocks (v7x megacore), as large as possible up to 1024."""
    if M % _SUB == 0:
        divs = [t for t in range(_SUB, min(_TM_MAX, M) + 1, _SUB) if M % t == 0]
        if divs:
            two_plus = [t for t in divs if M // t >= 2]
            tm = max(two_plus) if two_plus else max(divs)
            return tm, M
    # Fallback for awkward M: pad the row dim up to a multiple of TM.
    tm = min(_TM_MAX, _round_up(M, _SUB))
    if _round_up(M, tm) // tm < 2 and M > _SUB:
        tm = _round_up((M + 1) // 2, _SUB)
    return tm, _round_up(M, tm)


# -----------------------------------------------------------------------------
# Pallas kernel: one row-tile of the patch-projection GEMM per grid step.
# -----------------------------------------------------------------------------
def _patch_embed_kernel(x_ref, w_ref, b_ref, o_ref):
    # x_ref : (TM, K)      bf16 im2col'ed patch rows  (K = C*P*P)
    # w_ref : (K, E_pad)   bf16 reshaped conv weight  (lane-dense E)
    # b_ref : (1, E_pad)   f32 bias
    # o_ref : (TM, E_pad)  f32 output tile
    acc = jnp.dot(x_ref[...], w_ref[...], preferred_element_type=jnp.float32)
    o_ref[...] = (acc + b_ref[...]).astype(o_ref.dtype)


# -----------------------------------------------------------------------------
# Wrapper: NCHW -> bf16 im2col rows, tiled GEMM via pallas_call, token reshape.
# -----------------------------------------------------------------------------
def patch_embed_pallas(x_nchw, w, b, patch_size):
    B, C, H, W = x_nchw.shape
    E = w.shape[0]                      # embed_dim
    P = patch_size
    assert H % P == 0 and W % P == 0, "img_size must be divisible by patch_size"
    Ho, Wo = H // P, W // P
    M = B * Ho * Wo                     # total number of patches
    K = C * P * P                       # fused contraction dim
    E_pad = _round_up(E, 128)           # lane-dense output / MXU N alignment

    # im2col in bf16: patch vector ordered (c, ph, pw) to match Conv2d OIHW.
    xb = x_nchw.astype(jnp.bfloat16)
    xi = xb.reshape(B, C, Ho, P, Wo, P)
    xi = jnp.transpose(xi, (0, 2, 4, 1, 3, 5))          # (B, Ho, Wo, C, P, P)
    xi = xi.reshape(M, K)

    wk = jnp.transpose(w.reshape(E, K), (1, 0)).astype(jnp.bfloat16)   # (K, E)
    wk = jnp.pad(wk, ((0, 0), (0, E_pad - E)))                          # (K, E_pad)
    bk = jnp.pad(b.astype(jnp.float32), (0, E_pad - E)).reshape(1, E_pad)

    TM, Mp = _choose_row_tile(M)
    if Mp != M:  # rare fallback; common shapes take the divisor path (no pad)
        xi = jnp.pad(xi, ((0, Mp - M), (0, 0)))

    cost = pl.CostEstimate(
        flops=2 * M * K * E,
        transcendentals=0,
        bytes_accessed=Mp * K * 2 + K * E_pad * 2 + E_pad * 4 + Mp * E_pad * 4,
    )

    out = pl.pallas_call(
        _patch_embed_kernel,
        out_shape=jax.ShapeDtypeStruct((Mp, E_pad), jnp.float32),
        grid_spec=pltpu.PrefetchScalarGridSpec(
            num_scalar_prefetch=0,
            grid=(Mp // TM,),
            in_specs=[
                pl.BlockSpec((TM, K), lambda i: (i, 0)),      # patch rows (pipelined)
                pl.BlockSpec((K, E_pad), lambda i: (0, 0)),   # weight (grid-invariant)
                pl.BlockSpec((1, E_pad), lambda i: (0, 0)),   # bias   (grid-invariant)
            ],
            out_specs=pl.BlockSpec((TM, E_pad), lambda i: (i, 0)),
        ),
        compiler_params=pltpu.CompilerParams(
            dimension_semantics=("parallel",),
            vmem_limit_bytes=32 * 1024 * 1024,
        ),
        cost_estimate=cost,
    )(xi, wk, bk)

    # (Mp, E_pad) -> (B, num_patches, E), dropping padded rows / lanes.
    return out[:M, :E].reshape(B, Ho * Wo, E)


# -----------------------------------------------------------------------------
# Pure-JAX f32 reference (strided conv + flatten + transpose), for correctness.
# -----------------------------------------------------------------------------
def patch_embed_ref(x, w, b, patch_size):
    dn = ('NCHW', 'OIHW', 'NCHW')
    y = lax.conv_general_dilated(x, w, (patch_size, patch_size), 'VALID',
                                 dimension_numbers=dn)
    y = y + b[None, :, None, None]
    B, E, Ho, Wo = y.shape
    return jnp.transpose(y.reshape(B, E, Ho * Wo), (0, 2, 1))


if __name__ == "__main__":
    # Small shapes consistent with the module: img 16x16, patch 4, 4 -> 32 dims.
    B, C, H, W = 2, 4, 16, 16
    P = 4
    E = 32

    key = jax.random.PRNGKey(0)
    k_x, k_w, k_b = jax.random.split(key, 3)

    fan_in = C * P * P
    bound = 1.0 / (fan_in ** 0.5)
    x = jax.random.normal(k_x, (B, C, H, W), dtype=jnp.float32)
    w = jax.random.uniform(k_w, (E, C, P, P), jnp.float32, -bound, bound)
    b = jax.random.uniform(k_b, (E,), jnp.float32, -bound, bound)

    out = jax.block_until_ready(patch_embed_pallas(x, w, b, P))
    ref = patch_embed_ref(x, w, b, P)

    num_patches = (H // P) * (W // P)
    assert out.shape == (B, num_patches, E), out.shape
    # bf16 GEMM operands vs f32 conv reference -> loosened tolerance.
    assert jnp.allclose(out, ref, rtol=2e-2, atol=2e-2), "mismatch vs reference"
    print("KERNEL_OK")
</pallas_src>

<mosaic_0001>
module attributes {stable_mosaic.version = 11 : i64} {
  func.func @_patch_embed_kernel(%arg0: i32, %arg1: memref<16x64xbf16, #tpu.memory_space<vmem>>, %arg2: memref<64x128xbf16, #tpu.memory_space<vmem>>, %arg3: memref<1x128xf32, #tpu.memory_space<vmem>>, %arg4: memref<16x128xf32, #tpu.memory_space<vmem>>) attributes {dimension_semantics = [#tpu.dimension_semantics<parallel>], iteration_bounds = array<i64: 2>, scalar_prefetch = 0 : i64, scratch_operands = 0 : i64, tpu.core_type = #tpu.core_type<tc>, window_params = [{transform_indices = @transform_0, window_bounds = array<i64: 16, 64>}, {pipeline_mode = #tpu.pipeline_mode<synchronous>, transform_indices = @transform_1, window_bounds = array<i64: 64, 128>}, {pipeline_mode = #tpu.pipeline_mode<synchronous>, transform_indices = @transform_2, window_bounds = array<i64: 1, 128>}, {transform_indices = @transform_3, window_bounds = array<i64: 16, 128>}]} {
    %c0 = arith.constant 0 : index
    %c0_0 = arith.constant 0 : index
    %0 = vector.load %arg1[%c0, %c0_0] : memref<16x64xbf16, #tpu.memory_space<vmem>>, vector<16x64xbf16>
    %c0_1 = arith.constant 0 : index
    %c0_2 = arith.constant 0 : index
    %1 = vector.load %arg2[%c0_1, %c0_2] : memref<64x128xbf16, #tpu.memory_space<vmem>>, vector<64x128xbf16>
    %cst = arith.constant dense<0.000000e+00> : vector<16x128xf32>
    %2 = tpu.matmul %0, %1, %cst {dimension_numbers = #tpu.dot_dimension_numbers<[1], [0], [0], [1], [0, 0, 1, 1], [], []>} : vector<16x64xbf16>, vector<64x128xbf16>, vector<16x128xf32> -> vector<16x128xf32>
    %c0_3 = arith.constant 0 : index
    %c0_4 = arith.constant 0 : index
    %3 = vector.load %arg3[%c0_3, %c0_4] : memref<1x128xf32, #tpu.memory_space<vmem>>, vector<1x128xf32>
    %4 = vector.broadcast %3 : vector<1x128xf32> to vector<16x128xf32>
    %5 = arith.addf %2, %4 : vector<16x128xf32>
    %c0_5 = arith.constant 0 : index
    %c0_6 = arith.constant 0 : index
    %6 = vector.load %arg4[%c0_5, %c0_6] : memref<16x128xf32, #tpu.memory_space<vmem>>, vector<16x128xf32>
    tpu.vector_store %arg4[%c0_5, %c0_6], %5 {strides = array<i32>} : memref<16x128xf32, #tpu.memory_space<vmem>>, vector<16x128xf32>,
    return
  }
  func.func @transform_0(%arg0: i32) -> (i32, i32) {
    %c0_i32 = arith.constant 0 : i32
    %c0_i32_0 = arith.constant 0 : i32
    return %arg0, %c0_i32 : i32, i32
  }
  func.func @transform_1(%arg0: i32) -> (i32, i32) {
    %c0_i32 = arith.constant 0 : i32
    %c0_i32_0 = arith.constant 0 : i32
    %c0_i32_1 = arith.constant 0 : i32
    return %c0_i32, %c0_i32_0 : i32, i32
  }
  func.func @transform_2(%arg0: i32) -> (i32, i32) {
    %c0_i32 = arith.constant 0 : i32
    %c0_i32_0 = arith.constant 0 : i32
    %c0_i32_1 = arith.constant 0 : i32
    return %c0_i32, %c0_i32_0 : i32, i32
  }
  func.func @transform_3(%arg0: i32) -> (i32, i32) {
    %c0_i32 = arith.constant 0 : i32
    %c0_i32_0 = arith.constant 0 : i32
    return %arg0, %c0_i32 : i32, i32
  }
}

</mosaic_0001>

<bundles_post_ra>
// kernel: tpu_custom_call.1
= control target key start
LH: loop header
LB: loop body
LE: loop exit
PB: predicated region body
PF: predicated region fallthrough
CT: control target
= control target key end

     0   :  { %8 = vsyncpa [#allocation3], 0  ;;  %s877_s0 = inlined_call_operand.hbm [shape: bf16[32,64], index: 0, kind: input, shape index: {}]   ;;  %s878_s1 = inlined_call_operand.hbm [shape: bf16[64,128], index: 1, kind: input, shape index: {}]   ;;  %s879_s2 = inlined_call_operand.vmem [shape: f32[1,128], index: 2, kind: input, shape index: {}]   ;;  %s880_s3 = inlined_call_operand.hbm [shape: f32[32,128], index: 3, kind: output, shape index: {}]  }
   0x1   :  { %10 = vsyncpa [#allocation3 + $0x1], 0 }
   0x2   :  { %11 = vsyncpa [#allocation6], 0 }
   0x3   :  { %12 = vsyncpa [#allocation4], 0 }
   0x4   :  { %14 = vsyncpa [#allocation4 + $0x1], 0  ;;  %s666_s12 = smov 0   ;;  %s668_s13 = smov 0  }
   0x5   :  { %s670_s14 = smov 0   ;;  %s672_s15 = smov 0  }
   0x6 LB: > { %s687_s16 = sadd.s32 4294967295, %s635_s15   ;;  %s397_s17 = sadd.s32 4294967294, %s635_s15   ;;  %s635_s15 = sphi %s672_s15, %s900_s15   ;;  %s631_s14 = sphi %s670_s14, %s899_s14   ;;  %s627_s13 = sphi %s668_s13, %s898_s13   ;;  %s623_s12 = sphi %s666_s12, %s897_s12  }
   0x7   : > { %p40_p0 = scmp.ne.s32.totalorder %s627_s13, %s623_s12  ;;  %p881_p1 = scmp.eq.s32.totalorder %s687_s16, 0 }
   0x8   : > { %p112_p3 = scmp.eq.s32.totalorder %s397_s17, 1  ;;  %p398_p5 = scmp.ge.s32.totalorder %s635_s15, 1 }
   0x9   : > { %p696_p4 = por %p881_p1, %p40_p0  ;;  %p119_p7 = scmp.lt.s32.totalorder %s635_s15, 3 }
   0xa   : > { %p701_p6 = por %p112_p3, %p40_p0  ;;  %s637_s21 = smov [#allocation5]  }
   0xb   : > { %s884_s18 = scalar_select %p696_p4, 1, 0 }
   0xc   : > { %s885_s19 = scalar_select %p701_p6, 1, 0 }
   0xd   : > { %p706_p8 = pnand %p398_p5, %p119_p7  ;;  %s131_s22 = sshll.u32 %s637_s21, 4  ;;  %s710_s22 = int_to_ptr.vmem [resolvable:$true] %s131_s22 }
   0xe   : > { %s722_s24 = sadd.s32 1, %s635_s15   ;;  %s27_s25 = sadd.s32 1, %s631_s14 }
   0xf   : > { %s886_s20 = scalar_select %p706_p8, 1, 0 }
  0x10   : > { %p447_p9 = pneg %p706_p8  ;;  %s24_s26 = ssub.s32 %s635_s15, %s722_s24 }
  0x11   : > { %s507_s29 = scalar_lea.hbm %s878_s1, 512 }
  0x12   : > { %p717_p11 = pnand %p447_p9, %p881_p1  ;;  %p508_p12 = scmp.ne.s32.totalorder %s878_s1, %s507_s29 }
  0x13   : > { %p514_p5 = scmp.lt.u32.totalorder %s507_s29, %s878_s1 }
  0x14   : > { %p509_p13 = pneg %p717_p11 }
  0x16   : > { %p510_p0 = pnand %p509_p13, %p508_p12 }
  0x18   : > { %p511_p3 = pneg %p510_p0 }
  0x1a   : > { %p516_p7 = pnand %p514_p5, %p511_p3 }
  0x1c   : > { %519 = shalt.err (!%p516_p7)
}
  0x1d   : > { %s520_s7 = scalar_lea.vmem %s710_s22, 512  ;;  %p528_p2 = scmp.lt.s32.totalorder %s710_s22, %s710_s22 }
  0x1e   : > { %p521_p9 = scmp.ne.s32.totalorder %s710_s22, %s520_s7  ;;  %p529_p6 = scmp.lt.s32.totalorder %s520_s7, %s520_s7 }
  0x20   : > { %p523_p10 = pnand %p521_p9, %p509_p13  ;;  %p530_p4 = por %p529_p6, %p528_p2 }
  0x22   : > { %p524_p1 = pneg %p523_p10 }
  0x24   : > { %p531_p8 = pnand %p530_p4, %p524_p1 }
  0x26   : > { %534 = shalt.err (!%p531_p8)
}
  0x27   : > { %s638_s8 = smov 64   ;;  %s639_s9 = smov 4  }
  0x28   : > { %450 = dma.hbm_to_vmem [thread:$0]  (!%p717_p11), %s878_s1, 512, %s710_s22, [#allocation6], %s638_s8, %s638_s8, %s639_s9  }
  0x29   : > { %p25_p1 = scmp.eq.s32.totalorder %s24_s26, 0  ;;  %p34_p2 = scmp.ne.s32.totalorder %s631_s14, %s627_s13 }
  0x2a   : > { %p35_p4 = scmp.eq.s32.totalorder %s635_s15, 0  ;;  %p460_p6 = scmp.lt.s32.totalorder %s635_s15, 2 }
  0x2b   : > { %s756_s17 = scalar_select %p25_p1, %s631_s14, %s27_s25  }
  0x2c   : > { %p36_p8 = por %p35_p4, %p34_p2  ;;  %p888_p10 = scmp.eq.s32.totalorder %s687_s16, 1 }
  0x2d   : > { %s148_s23 = sand.u32 1, %s631_s14   ;;  %s420_s27 = sshll.u32 %s635_s15, 7 }
  0x2e   : > { %p760_p12 = por %p888_p10, %p34_p2  ;;  %s401_s28 = sshll.u32 %s148_s23, 3 }
  0x2f   : > { %s769_s4 = scalar_lea.hbm %s877_s0, %s420_s27  ;;  %s152_s22 = scalar_lea.vmem [#allocation2], %s401_s28 }
  0x30   : > { %s159_s25 = sshll.u32 %s152_s22, 4  ;;  %p771_p11 = pnand %p460_p6, %p36_p8  ;;  %s775_s25 = int_to_ptr.vmem [resolvable:$true] %s159_s25 }
  0x31   : > { %s777_s5 = scalar_lea.sflag [#allocation3], %s148_s23  ;;  %s535_s6 = scalar_lea.hbm %s769_s4, 128 }
  0x32   : > { %p536_p13 = scmp.ne.s32.totalorder %s769_s4, %s535_s6  ;;  %p537_p0 = pneg %p771_p11 }
  0x33   : > { %s540_s11 = scalar_lea.hbm %s877_s0, 256  ;;  %p541_p7 = scmp.lt.u32.totalorder %s769_s4, %s877_s0 }
  0x34   : > { %p538_p3 = pnand %p537_p0, %p536_p13  ;;  %p542_p9 = scmp.lt.u32.totalorder %s540_s11, %s535_s6 }
  0x35   : > { %p544_p2 = scmp.lt.u32.totalorder %s535_s6, %s769_s4 }
  0x36   : > { %p539_p5 = pneg %p538_p3  ;;  %p543_p1 = por %p542_p9, %p541_p7 }
  0x38   : > { %p545_p4 = por %p544_p2, %p543_p1 }
  0x3a   : > { %p546_p6 = pnand %p545_p4, %p539_p5 }
  0x3c   : > { %549 = shalt.err (!%p546_p6)
}
  0x3d   : > { %s550_s23 = scalar_lea.vmem %s775_s25, 128  ;;  %s640_s29 = smov [#allocation2]  }
  0x3e   : > { %p551_p8 = scmp.ne.s32.totalorder %s775_s25, %s550_s23  ;;  %s555_s30 = sshll.u32 %s640_s29, 4  ;;  %s556_s30 = int_to_ptr.vmem [resolvable:$false] %s555_s30 }
  0x3f   : > { %s557_s22 = scalar_lea.vmem %s556_s30, 256  ;;  %p558_p3 = scmp.lt.s32.totalorder %s775_s25, %s556_s30 }
  0x40   : > { %p553_p10 = pnand %p551_p8, %p537_p0  ;;  %p559_p7 = scmp.lt.s32.totalorder %s557_s22, %s550_s23 }
  0x42   : > { %p554_p13 = pneg %p553_p10  ;;  %p560_p9 = por %p559_p7, %p558_p3 }
  0x44   : > { %p561_p1 = pnand %p560_p9, %p554_p13 }
  0x46   : > { %564 = shalt.err (!%p561_p1)
}
  0x47   : > { %454 = dma.hbm_to_vmem [thread:$0]  (!%p771_p11), %s769_s4, 128, %s775_s25, %s777_s5, %s638_s8, %s638_s8, %s639_s9  }
  0x48   : > { %p891_p0 = scmp.ne.s32.totalorder %s886_s20, 0 }
  0x49   : > { %s811_s6 = sand.u32 (!%p891_p0), 1, %s627_s13   ;;  %p892_p5 = scmp.ne.s32.totalorder (!%p891_p0), %s884_s18, 0 }
  0x4a   : > { %171 = sbr.rel (%p891_p0) target bundleno = 333 (0x14d), region = 32  ;;  %s405_s7 = sshll.u32 (!%p891_p0), %s811_s6, 3 }
  0x4b   : > { %s174_s10 = scalar_lea.sflag (!%p891_p0), [#allocation3], %s811_s6  ;;  %s177_s11 = scalar_lea.vmem (!%p891_p0), [#allocation2], %s405_s7 }
  0x51   : > { %610 = dma.done.wait (%p892_p5), %s174_s10, 128  }
  0x52   : > { %612 = vsyncadd (%p892_p5), %s174_s10, 4294967168  ;;  %p893_p2 = scmp.eq.s32.totalorder %s687_s16, 0 }
  0x54   : > { %614 = dma.done.wait (%p893_p2), [#allocation6], 512   ;;  %p894_p11 = pmov %p893_p2 }
  0x55   : > { %v641_v0 = vmov 0.0   ;;  %vm642_vm0 = vmmov 0   ;;  %v502_v1 = vld [vmem:[#allocation5] sm:$0xff]   ;;  %v503_v2 = vld [vmem:[#allocation5 + $0x8] sm:$0xff]   ;;  %v504_v3 = vld [vmem:[#allocation5 + $0x10] sm:$0xff]   ;;  %vm253_vm1 = vcmask 523264  }
  0x56   : > { %616 = vsyncadd (%p894_p11), [#allocation6], 4294966784  ;;  %427 = vmatprep.subr.bf16.mxu0 %v641_v0  ;;  %435 = vmatprep.mubr.msk.bf16.mxu0 %vm642_vm0, %v641_v0  ;;  %v505_v4 = vld [vmem:[#allocation5 + $0x18] sm:$0xff]   ;;  %s407_s18 = sshll.u32 %s811_s6, 4  ;;  %v408_v6 = vld [vmem:[%s879_s2] ss:$0 sm:$0xff] }
  0x57   : > { %428 = vmatpush3.bf16.msra.mxu0 %v502_v1  ;;  %v506_v5 = vld [vmem:[%s177_s11] sm:$0xff]   ;;  %s203_s9 = scalar_lea.vmem [#allocation7], %s407_s18  ;;  %s421_s25 = sshll.u32 %s687_s16, 8 }
  0x58   : > { %429 = vmatprep.subr.bf16.mxu0 %v641_v0  ;;  %s314_s4 = sshll.u32 %s203_s9, 4  ;;  %s833_s27 = scalar_lea.hbm %s880_s3, %s421_s25  ;;  %s828_s4 = int_to_ptr.vmem [resolvable:$true] %s314_s4 }
  0x59   : > { %s301_s28 = scalar_lea.sflag [#allocation4], %s811_s6  ;;  %s565_s16 = scalar_lea.vmem %s828_s4, 256 }
  0x5a   : > { %p566_p4 = scmp.ne.s32.totalorder %s828_s4, %s565_s16  ;;  %s643_s23 = smov [#allocation7]  }
  0x5b   : > { %430 = vmatpush3.bf16.msra.mxu0 %v503_v2  ;;  %s569_s29 = sshll.u32 %s643_s23, 4  ;;  %s570_s29 = int_to_ptr.vmem [resolvable:$false] %s569_s29 }
  0x5c   : > { %431 = vmatprep.subr.bf16.mxu0 %v641_v0  ;;  %p567_p6 = pnand %p566_p4, %p760_p12  ;;  %s571_s30 = scalar_lea.vmem %s570_s29, 512 }
  0x5d   : > { %p572_p10 = scmp.lt.s32.totalorder %s828_s4, %s570_s29  ;;  %p573_p13 = scmp.lt.s32.totalorder %s571_s30, %s565_s16 }
  0x5e   : > { %p568_p8 = pneg %p567_p6 }
  0x5f   : > { %432 = vmatpush3.bf16.msra.mxu0 %v504_v3  ;;  %p574_p3 = por %p573_p13, %p572_p10 }
  0x60   : > { %433 = vmatprep.subr.bf16.mxu0 %v641_v0 }
  0x61   : > { %p575_p7 = pnand %p574_p3, %p568_p8 }
  0x63   : > { %434 = vmatpush3.bf16.msra.mxu0 %v505_v4 }
  0x66   : > { %436 = vmatmul.mubr.msk.bf16.vlgmr.msra.gmra.mrb[0].mxu0 %vm253_vm1, %v506_v5 }
 0x139   : > { %v291_v7 = vpop.f32.mrb[0].mxu0 }
 0x13a   : > { %v292_v8 = vadd.f32 %v408_v6, %v291_v7  ;;  %v437_v9 = vpop.f32.mrb[1].mxu0 }
 0x13b   : > { %v294_v10 = vpop.f32.mrb[2].mxu0 }
 0x13c   : > { %298 = vst [vmem:[%s203_s9] sm:$0xff] %v292_v8  ;;  %v295_v11 = vadd.f32 %v408_v6, %v294_v10  ;;  %v438_v12 = vpop.f32.mrb[3].mxu0 }
 0x13e   : > { %299 = vst [vmem:[%s203_s9 + $0x8] sm:$0xff] %v295_v11 }
 0x13f   : > { %578 = shalt.err (!%p575_p7)
}
 0x140   : > { %s579_s22 = scalar_lea.hbm %s833_s27, 256  ;;  %s583_s11 = scalar_lea.hbm %s880_s3, 512 }
 0x141   : > { %p580_p9 = scmp.ne.s32.totalorder %s833_s27, %s579_s22  ;;  %p584_p5 = scmp.lt.u32.totalorder %s833_s27, %s880_s3 }
 0x142   : > { %p585_p2 = scmp.lt.u32.totalorder %s583_s11, %s579_s22  ;;  %p587_p4 = scmp.lt.u32.totalorder %s579_s22, %s833_s27 }
 0x143   : > { %p581_p1 = pnand %p580_p9, %p760_p12 }
 0x144   : > { %p586_p11 = por %p585_p2, %p584_p5 }
 0x145   : > { %p582_p0 = pneg %p581_p1 }
 0x146   : > { %p588_p6 = por %p587_p4, %p586_p11 }
 0x148   : > { %p589_p8 = pnand %p588_p6, %p582_p0 }
 0x14a   : > { %592 = shalt.err (!%p589_p8)
}
 0x14b   : > { %s644_s8 = smov 128   ;;  %s645_s9 = smov 8  }
 0x14c   : > { %445 = dma.vmem_to_hbm [thread:$0]  (%p760_p12), %s828_s4, 256, %s833_s27, %s301_s28, %s644_s8, %s644_s8, %s645_s9  }
 0x14d PF: > { %s329_s25 = sand.u32 1, %s623_s12   ;;  %p895_p10 = scmp.ne.s32.totalorder %s885_s19, 0 }
 0x14e   : > { %p896_p13 = scmp.ge.s32.totalorder %s635_s15, 2  ;;  %s330_s26 = scalar_lea.sflag [#allocation4], %s329_s25 }
 0x150   : > { %p456_p3 = pnand %p896_p13, %p895_p10 }
 0x152   : > { %618 = dma.done.wait (!%p456_p3), %s330_s26, 256  }
 0x153   : > { %620 = vsyncadd (!%p456_p3), %s330_s26, 4294967040  ;;  %p17_p7 = scmp.ge.s32.totalorder %s722_s24, 4   ;;  %s897_s12 = smov %s627_s13 }
 0x154   : > { %s898_s13 = smov %s631_s14  ;;  %s899_s14 = smov %s756_s17 }
 0x155   : > { %s900_s15 = smov %s722_s24  ;;  %19 = sbr.rel (!%p17_p7) target bundleno = 6 (0x6), region = 81 }
 0x15c   :  { %335 = vsyncpa [#allocation3], 1 }
 0x15d   :  { %337 = vsyncpa [#allocation3 + $0x1], 1 }
 0x15e   :  { %338 = vsyncpa [#allocation6], 1 }
 0x15f   :  { %339 = vsyncpa [#allocation4], 1 }
 0x160   :  { %341 = vsyncpa [#allocation4 + $0x1], 1 }

</bundles_post_ra>
